<compile_context>
chip_gen: v5e
topology: v5e:2x2
jax: 0.10.0
libtpu: 0.0.40
codegen_flags: <defaults>
</compile_context>

<pallas_src>
import jax
import jax.numpy as jnp
from jax.experimental import pallas as pl
from jax.experimental.pallas import tpu as pltpu


_LANE = 128      # lane width: last-dim alignment
_SUBLANE = 8     # f32 sublane alignment for the batch (second-to-last) dim


def _round_up(x: int, m: int) -> int:
    return ((x + m - 1) // m) * m


# ----------------------------------------------------------------------------
# Capability / hardware probes
# ----------------------------------------------------------------------------

_BUFFERED_OK = None


def _probe_buffered() -> bool:
    """One-time capability probe for pl.Buffered(1) single-buffering.

    Runs a tiny 2-step pipelined copy with a single-buffered, index-changing
    input.  Real kernel builds never swallow errors; only this probe does.
    """
    global _BUFFERED_OK
    if _BUFFERED_OK is not None:
        return _BUFFERED_OK
    try:
        def _k(x_ref, o_ref):
            o_ref[...] = x_ref[...] * 2.0

        x = jnp.ones((16, 128), jnp.float32)
        out = pl.pallas_call(
            _k,
            out_shape=jax.ShapeDtypeStruct((16, 128), jnp.float32),
            grid=(2,),
            in_specs=[pl.BlockSpec((8, 128), lambda i: (i, 0),
                                   pipeline_mode=pl.Buffered(1))],
            out_specs=pl.BlockSpec((8, 128), lambda i: (i, 0)),
        )(x)
        jax.block_until_ready(out)
        _BUFFERED_OK = bool(jnp.allclose(out, 2.0))
    except Exception:  # capability probe only
        _BUFFERED_OK = False
    return _BUFFERED_OK


def _chip_info():
    """Best-effort generation probe -> (vmem_budget_bytes, num_tensorcores, min_tb)."""
    vmem_cap = 128 << 20
    try:
        info = pltpu.get_tpu_info()
        vmem_cap = int(getattr(info, "vmem_capacity_bytes", vmem_cap))
    except Exception:
        pass
    kind = ""
    try:
        kind = (jax.devices()[0].device_kind or "").lower()
    except Exception:
        pass

    is_v7x = ("v7" in kind) or (vmem_cap <= (64 << 20))
    is_v5e = ("v5 lite" in kind) or ("v5e" in kind) or ("v5lite" in kind)

    num_tc = 2 if is_v7x else 1
    min_tb = 128 if is_v5e else 256
    if vmem_cap <= (64 << 20):
        vmem_budget = 48 << 20                       # v7x: leave ~25% headroom
    else:
        vmem_budget = min(vmem_cap - (28 << 20), 100 << 20)
    vmem_budget = max(vmem_budget, 32 << 20)
    return vmem_budget, num_tc, min_tb


# ----------------------------------------------------------------------------
# Kernels
# ----------------------------------------------------------------------------

def _qnn_resident_kernel(x_ref, w1_ref, b1_ref, w2_ref, b2_ref, w3_ref, b3_ref,
                         o_ref):
    """Weights fully resident in VMEM; one batch tile per grid step."""
    h1 = jnp.dot(x_ref[...], w1_ref[...], preferred_element_type=jnp.float32)
    h1 = jnp.maximum(h1 + b1_ref[...], 0.0)
    h2 = jnp.dot(h1.astype(w2_ref.dtype), w2_ref[...],
                 preferred_element_type=jnp.float32)
    h2 = jnp.maximum(h2 + b2_ref[...], 0.0)
    out = jnp.dot(h2.astype(w3_ref.dtype), w3_ref[...],
                  preferred_element_type=jnp.float32) + b3_ref[...]
    o_ref[...] = out.astype(o_ref.dtype)


def _qnn_streamed_kernel(x_ref, w1_ref, b1_ref, w2_ref, b2_ref, w3_ref, b3_ref,
                         o_ref, acc_ref):
    """One (batch-tile i, hidden-k-tile k) grid step; W1/W2 streamed in blocks."""
    k = pl.program_id(1)

    @pl.when(k == 0)
    def _init():
        acc_ref[...] = jnp.zeros_like(acc_ref)

    # Layer 1, k-th hidden column block: (tb, Dp) @ (Dp, tk) -> (tb, tk).
    h1 = jnp.dot(x_ref[...], w1_ref[0], preferred_element_type=jnp.float32)
    h1 = jnp.maximum(h1 + b1_ref[...], 0.0)

    # Layer 2 partial sum over the hidden contraction axis.
    acc_ref[...] += jnp.dot(h1.astype(w2_ref.dtype), w2_ref[...],
                            preferred_element_type=jnp.float32)

    # Last k step: finish layer 2 (bias + ReLU) and run layer 3.
    @pl.when(k == pl.num_programs(1) - 1)
    def _finalize():
        h2 = jnp.maximum(acc_ref[...] + b2_ref[...], 0.0)
        out = jnp.dot(h2.astype(w3_ref.dtype), w3_ref[...],
                      preferred_element_type=jnp.float32) + b3_ref[...]
        o_ref[...] = out.astype(o_ref.dtype)


# ----------------------------------------------------------------------------
# pallas_call builders
# ----------------------------------------------------------------------------

def _build_resident_call(Bp, Dp, Hp, Op, tb, out_dtype, vmem_limit, cost,
                         buffered_ok):
    nb = Bp // tb
    single = {"pipeline_mode": pl.Buffered(1)} if buffered_ok else {}
    in_specs = [
        # x tile changes every step -> keep default double buffering.
        pl.BlockSpec((tb, Dp), lambda i: (i, 0)),
        # Fully resident weights / biases; single-buffered (loaded once).
        pl.BlockSpec((Dp, Hp), lambda i: (0, 0), **single),
        pl.BlockSpec((1, Hp), lambda i: (0, 0), **single),
        pl.BlockSpec((Hp, Hp), lambda i: (0, 0), **single),
        pl.BlockSpec((1, Hp), lambda i: (0, 0), **single),
        pl.BlockSpec((Hp, Op), lambda i: (0, 0), **single),
        pl.BlockSpec((1, Op), lambda i: (0, 0), **single),
    ]
    return pl.pallas_call(
        _qnn_resident_kernel,
        out_shape=jax.ShapeDtypeStruct((Bp, Op), out_dtype),
        grid=(nb,),
        in_specs=in_specs,
        out_specs=pl.BlockSpec((tb, Op), lambda i: (i, 0)),
        compiler_params=pltpu.CompilerParams(
            dimension_semantics=("parallel",),
            vmem_limit_bytes=vmem_limit),
        cost_estimate=cost,
    )


def _build_streamed_call(Bp, Dp, Hp, Op, tb, tk, out_dtype, vmem_limit, cost,
                         buffered_ok):
    nb, nk = Bp // tb, Hp // tk
    single = {"pipeline_mode": pl.Buffered(1)} if buffered_ok else {}
    in_specs = [
        # x: block index changes only at batch-tile boundaries -> single-buffer.
        pl.BlockSpec((tb, Dp), lambda i, k: (i, 0), **single),
        # W1: contiguous slab k of the pre-reshaped (nk, Dp, tk) array (streamed).
        pl.BlockSpec((1, Dp, tk), lambda i, k: (k, 0, 0)),
        pl.BlockSpec((1, tk), lambda i, k: (0, k)),
        # W2: k-th row block along the contraction axis (streamed).
        pl.BlockSpec((tk, Hp), lambda i, k: (k, 0)),
        # Constant, fully resident operands.
        pl.BlockSpec((1, Hp), lambda i, k: (0, 0), **single),
        pl.BlockSpec((Hp, Op), lambda i, k: (0, 0), **single),
        pl.BlockSpec((1, Op), lambda i, k: (0, 0), **single),
    ]
    return pl.pallas_call(
        _qnn_streamed_kernel,
        out_shape=jax.ShapeDtypeStruct((Bp, Op), out_dtype),
        grid=(nb, nk),
        in_specs=in_specs,
        out_specs=pl.BlockSpec((tb, Op), lambda i, k: (i, 0)),
        scratch_shapes=[pltpu.VMEM((tb, Hp), jnp.float32)],
        compiler_params=pltpu.CompilerParams(
            dimension_semantics=("parallel", "arbitrary"),
            vmem_limit_bytes=vmem_limit),
        cost_estimate=cost,
    )


# ----------------------------------------------------------------------------
# Public wrapper
# ----------------------------------------------------------------------------

def qnn_forward(x, w1, b1, w2, b2, w3, b3, *, tb=None, tk=None,
                use_bf16_matmul=True, path="auto"):
    """Fused Qnn forward pass (Linear-ReLU-Linear-ReLU-Linear).

    x : (B, input_dim);  w{i}: PyTorch nn.Linear layout (out_features, in_features);
    b{i}: (out_features,).  Returns (B, out_dim) in x.dtype.
    """
    assert path in ("auto", "resident", "streamed")
    B, input_dim = x.shape
    hidden_dim = w1.shape[0]
    out_dim = w3.shape[0]
    assert w1.shape == (hidden_dim, input_dim)
    assert w2.shape == (hidden_dim, hidden_dim)
    assert w3.shape == (out_dim, hidden_dim)

    out_dtype = x.dtype
    compute_dtype = jnp.bfloat16 if use_bf16_matmul else x.dtype
    csize = jnp.dtype(compute_dtype).itemsize
    osize = jnp.dtype(out_dtype).itemsize

    vmem_budget, num_tc, min_tb = _chip_info()
    buffered_ok = _probe_buffered()

    # Feature dims padded to the 128-lane width (exact: zero pads stay zero).
    Dp = _round_up(input_dim, _LANE)
    Hp0 = _round_up(hidden_dim, _LANE)
    Op = _round_up(out_dim, _LANE)

    # ---- batch tile ---------------------------------------------------------
    if tb is None:
        if B <= min_tb:
            # Single tile covering the batch: no forced pure-padding tiles.
            tb = _round_up(max(B, 1), _SUBLANE)
        else:
            target_tiles = 4 if num_tc >= 2 else 2     # >=2 tiles/TC on v7x
            tb = max(min_tb, _round_up(pl.cdiv(B, target_tiles), _SUBLANE))
            tb = min(tb, 512)
    else:
        tb = max(_SUBLANE, _round_up(tb, _SUBLANE))

    # ---- path selection -----------------------------------------------------
    wbufs = 1 if buffered_ok else 2
    resident_need = (wbufs * (csize * (Dp * Hp0 + Hp0 * Hp0 + Hp0 * Op)
                              + 4 * (2 * Hp0 + Op))
                     + 2 * tb * Dp * csize + 2 * tb * Op * osize)
    if path == "resident":
        use_resident = True
    elif path == "streamed":
        use_resident = False
    else:
        use_resident = resident_need <= vmem_budget

    if use_resident:
        Hp = Hp0
        vmem_need = resident_need
    else:
        # Hidden (contraction) tile: prefer tk >= 512 so accumulator RMW hides
        # under MXU time; pad Hp to a multiple of tk.
        if tk is None:
            if Hp0 >= 512:
                Hp = _round_up(Hp0, 512)
                cand = [512, 256, 128]
            else:
                Hp = Hp0
                cand = [Hp0] + [c for c in (256, 128) if c < Hp0 and Hp0 % c == 0]
        else:
            assert tk % _LANE == 0, "tk must be a multiple of 128"
            Hp = _round_up(Hp0, tk)
            cand = [tk]
        tk = cand[0]

        x_bufs = 1 if buffered_ok else 2

        def _need(tb_, tk_):
            return (x_bufs * tb_ * Dp * csize
                    + 2 * (Dp * tk_ * csize + tk_ * 4 + tk_ * Hp * csize)
                    + wbufs * (Hp * 4 + Hp * Op * csize + Op * 4)
                    + 2 * tb_ * Op * osize
                    + tb_ * Hp * 4)                       # f32 accumulator

        ci = 0
        while _need(tb, tk) > vmem_budget:
            if tb > 64:                                   # shrink tb before tk
                tb = max(64, _round_up(tb // 2, _SUBLANE))
            elif ci + 1 < len(cand):
                ci += 1
                tk = cand[ci]
            else:
                # TODO(synk): for very large hidden_dim on v7x, add a third grid
                # axis over layer-2's output dim (n2) to bound the (tb,Hp)
                # accumulator and the (tk,Hp) W2 block.
                break
        vmem_need = _need(tb, tk)

    nb = pl.cdiv(B, tb)
    Bp = nb * tb
    vmem_limit = int(min(max(vmem_need * 5 // 4, 32 << 20), vmem_budget))

    # ---- cost estimate (counts real HBM traffic incl. weight re-streaming) --
    flops = 2 * Bp * (Dp * Hp + Hp * Hp + Hp * Op)
    if use_resident:
        weight_bytes = csize * (Dp * Hp + Hp * Hp + Hp * Op)
    else:
        weight_bytes = nb * csize * (Dp * Hp + Hp * Hp) + csize * Hp * Op
    cost = pl.CostEstimate(
        flops=int(flops),
        transcendentals=0,
        bytes_accessed=int(Bp * Dp * csize + weight_bytes
                           + 4 * (2 * Hp + Op) + Bp * Op * osize),
    )

    # ---- pad + transpose parameters (weights stored (in, out): kernel does x @ W)
    def pad2(a, rows, cols):
        return jnp.pad(a, ((0, rows - a.shape[0]), (0, cols - a.shape[1])))

    def pad_bias(b, n):
        return jnp.pad(b, (0, n - b.shape[0])).reshape(1, n).astype(jnp.float32)

    x_p = pad2(x, Bp, Dp).astype(compute_dtype)
    w1_t = pad2(w1.T, Dp, Hp).astype(compute_dtype)
    w2_p = pad2(w2.T, Hp, Hp).astype(compute_dtype)
    w3_p = pad2(w3.T, Hp, Op).astype(compute_dtype)
    b1_p = pad_bias(b1, Hp)
    b2_p = pad_bias(b2, Hp)
    b3_p = pad_bias(b3, Op)

    if use_resident:
        call = _build_resident_call(Bp, Dp, Hp, Op, tb, out_dtype,
                                    vmem_limit, cost, buffered_ok)
        w1_p = w1_t
    else:
        nk = Hp // tk
        # Contiguous (nk, Dp, tk) slabs -> contiguous DMA per k step.
        w1_p = w1_t.reshape(Dp, nk, tk).transpose(1, 0, 2)
        call = _build_streamed_call(Bp, Dp, Hp, Op, tb, tk, out_dtype,
                                    vmem_limit, cost, buffered_ok)

    out_p = call(x_p, w1_p, b1_p, w2_p, b2_p, w3_p, b3_p)
    return out_p[:B, :out_dim]


# ----------------------------------------------------------------------------
# Demo / self-test
# ----------------------------------------------------------------------------

if __name__ == "__main__":
    key = jax.random.PRNGKey(0)

    def make_params(key, input_dim, hidden_dim, out_dim):
        ks = jax.random.split(key, 7)

        def uniform(k, shape, bound):
            return jax.random.uniform(k, shape, jnp.float32, -bound, bound)

        bnd1 = 1.0 / float(input_dim) ** 0.5
        bnd2 = 1.0 / float(hidden_dim) ** 0.5
        # PyTorch nn.Linear layout: W (out, in), b (out,).
        w1 = uniform(ks[1], (hidden_dim, input_dim), bnd1)
        b1 = uniform(ks[2], (hidden_dim,), bnd1)
        w2 = uniform(ks[3], (hidden_dim, hidden_dim), bnd2)
        b2 = uniform(ks[4], (hidden_dim,), bnd2)
        w3 = uniform(ks[5], (out_dim, hidden_dim), bnd2)
        b3 = uniform(ks[6], (out_dim,), bnd2)
        return ks[0], (w1, b1, w2, b2, w3, b3)

    def ref_forward(x, params):
        w1, b1, w2, b2, w3, b3 = params
        h1 = jnp.maximum(x @ w1.T + b1, 0.0)
        h2 = jnp.maximum(h1 @ w2.T + b2, 0.0)
        return h2 @ w3.T + b3

    # ---- Case 1: tiny shapes -> weights-resident fast path ------------------
    batch, input_dim, hidden_dim, out_dim = 8, 16, 32, 8
    k1, params1 = make_params(key, input_dim, hidden_dim, out_dim)
    x1 = jax.random.normal(k1, (batch, input_dim), dtype=jnp.float32)
    ref1 = ref_forward(x1, params1)

    out_f32 = jax.block_until_ready(
        qnn_forward(x1, *params1, use_bf16_matmul=False))
    assert out_f32.shape == (batch, out_dim)
    assert jnp.allclose(out_f32, ref1, atol=1e-4, rtol=1e-4), \
        float(jnp.max(jnp.abs(out_f32 - ref1)))

    out_bf16 = jax.block_until_ready(
        qnn_forward(x1, *params1, use_bf16_matmul=True))
    assert out_bf16.shape == (batch, out_dim)
    assert jnp.allclose(out_bf16, ref1, atol=5e-2, rtol=5e-2), \
        float(jnp.max(jnp.abs(out_bf16 - ref1)))

    # ---- Case 2: force the streamed (k-tiled) path, multiple batch/k tiles --
    batch2, in2, hid2, od2 = 80, 24, 200, 12
    k2, params2 = make_params(jax.random.PRNGKey(1), in2, hid2, od2)
    x2 = jax.random.normal(k2, (batch2, in2), dtype=jnp.float32)
    ref2 = ref_forward(x2, params2)

    out_s = jax.block_until_ready(
        qnn_forward(x2, *params2, tb=32, tk=128,
                    use_bf16_matmul=False, path="streamed"))
    assert out_s.shape == (batch2, od2)
    assert jnp.allclose(out_s, ref2, atol=1e-4, rtol=1e-4), \
        float(jnp.max(jnp.abs(out_s - ref2)))

    print("KERNEL_OK")
</pallas_src>

<mosaic_0001>
module attributes {stable_mosaic.version = 11 : i64} {
  func.func @_k(%arg0: i32, %arg1: memref<8x128xf32, #tpu.memory_space<vmem>>, %arg2: memref<8x128xf32, #tpu.memory_space<vmem>>) attributes {dimension_semantics = [#tpu.dimension_semantics<arbitrary>], iteration_bounds = array<i64: 2>, scalar_prefetch = 0 : i64, scratch_operands = 0 : i64, tpu.core_type = #tpu.core_type<tc>, window_params = [{pipeline_mode = #tpu.pipeline_mode<synchronous>, transform_indices = @transform_0, window_bounds = array<i64: 8, 128>}, {transform_indices = @transform_1, window_bounds = array<i64: 8, 128>}]} {
    %c0 = arith.constant 0 : index
    %c0_0 = arith.constant 0 : index
    %0 = vector.load %arg1[%c0, %c0_0] : memref<8x128xf32, #tpu.memory_space<vmem>>, vector<8x128xf32>
    %cst = arith.constant 2.000000e+00 : f32
    %1 = vector.broadcast %cst : f32 to vector<8x128xf32>
    %2 = arith.mulf %0, %1 : vector<8x128xf32>
    %c0_1 = arith.constant 0 : index
    %c0_2 = arith.constant 0 : index
    %3 = vector.load %arg2[%c0_1, %c0_2] : memref<8x128xf32, #tpu.memory_space<vmem>>, vector<8x128xf32>
    tpu.vector_store %arg2[%c0_1, %c0_2], %2 {strides = array<i32>} : memref<8x128xf32, #tpu.memory_space<vmem>>, vector<8x128xf32>,
    return
  }
  func.func @transform_0(%arg0: i32) -> (i32, i32) {
    %c0_i32 = arith.constant 0 : i32
    %c0_i32_0 = arith.constant 0 : i32
    return %arg0, %c0_i32 : i32, i32
  }
  func.func @transform_1(%arg0: i32) -> (i32, i32) {
    %c0_i32 = arith.constant 0 : i32
    %c0_i32_0 = arith.constant 0 : i32
    return %arg0, %c0_i32 : i32, i32
  }
}

module attributes {stable_mosaic.version = 11 : i64} {
  func.func @_qnn_resident_kernel(%arg0: i32, %arg1: memref<8x128xf32, #tpu.memory_space<vmem>>, %arg2: memref<128x128xf32, #tpu.memory_space<vmem>>, %arg3: memref<1x128xf32, #tpu.memory_space<vmem>>, %arg4: memref<128x128xf32, #tpu.memory_space<vmem>>, %arg5: memref<1x128xf32, #tpu.memory_space<vmem>>, %arg6: memref<128x128xf32, #tpu.memory_space<vmem>>, %arg7: memref<1x128xf32, #tpu.memory_space<vmem>>, %arg8: memref<8x128xf32, #tpu.memory_space<vmem>>) attributes {dimension_semantics = [#tpu.dimension_semantics<parallel>], iteration_bounds = array<i64: 1>, scalar_prefetch = 0 : i64, scratch_operands = 0 : i64, tpu.core_type = #tpu.core_type<tc>, window_params = [{transform_indices = @transform_0, window_bounds = array<i64: 8, 128>}, {pipeline_mode = #tpu.pipeline_mode<synchronous>, transform_indices = @transform_1, window_bounds = array<i64: 128, 128>}, {pipeline_mode = #tpu.pipeline_mode<synchronous>, transform_indices = @transform_2, window_bounds = array<i64: 1, 128>}, {pipeline_mode = #tpu.pipeline_mode<synchronous>, transform_indices = @transform_3, window_bounds = array<i64: 128, 128>}, {pipeline_mode = #tpu.pipeline_mode<synchronous>, transform_indices = @transform_4, window_bounds = array<i64: 1, 128>}, {pipeline_mode = #tpu.pipeline_mode<synchronous>, transform_indices = @transform_5, window_bounds = array<i64: 128, 128>}, {pipeline_mode = #tpu.pipeline_mode<synchronous>, transform_indices = @transform_6, window_bounds = array<i64: 1, 128>}, {transform_indices = @transform_7, window_bounds = array<i64: 8, 128>}]} {
    %c0 = arith.constant 0 : index
    %c0_0 = arith.constant 0 : index
    %0 = vector.load %arg1[%c0, %c0_0] : memref<8x128xf32, #tpu.memory_space<vmem>>, vector<8x128xf32>
    %c0_1 = arith.constant 0 : index
    %c0_2 = arith.constant 0 : index
    %1 = vector.load %arg2[%c0_1, %c0_2] : memref<128x128xf32, #tpu.memory_space<vmem>>, vector<128x128xf32>
    %cst = arith.constant dense<0.000000e+00> : vector<8x128xf32>
    %2 = tpu.matmul %0, %1, %cst {dimension_numbers = #tpu.dot_dimension_numbers<[1], [0], [0], [1], [0, 0, 1, 1], [], []>} : vector<8x128xf32>, vector<128x128xf32>, vector<8x128xf32> -> vector<8x128xf32>
    %c0_3 = arith.constant 0 : index
    %c0_4 = arith.constant 0 : index
    %3 = vector.load %arg3[%c0_3, %c0_4] : memref<1x128xf32, #tpu.memory_space<vmem>>, vector<1x128xf32>
    %4 = vector.broadcast %3 : vector<1x128xf32> to vector<8x128xf32>
    %5 = arith.addf %2, %4 : vector<8x128xf32>
    %cst_5 = arith.constant 0.000000e+00 : f32
    %6 = vector.broadcast %cst_5 : f32 to vector<8x128xf32>
    %7 = arith.maximumf %5, %6 : vector<8x128xf32>
    %c0_6 = arith.constant 0 : index
    %c0_7 = arith.constant 0 : index
    %8 = vector.load %arg4[%c0_6, %c0_7] : memref<128x128xf32, #tpu.memory_space<vmem>>, vector<128x128xf32>
    %cst_8 = arith.constant dense<0.000000e+00> : vector<8x128xf32>
    %9 = tpu.matmul %7, %8, %cst_8 {dimension_numbers = #tpu.dot_dimension_numbers<[1], [0], [0], [1], [0, 0, 1, 1], [], []>} : vector<8x128xf32>, vector<128x128xf32>, vector<8x128xf32> -> vector<8x128xf32>
    %c0_9 = arith.constant 0 : index
    %c0_10 = arith.constant 0 : index
    %10 = vector.load %arg5[%c0_9, %c0_10] : memref<1x128xf32, #tpu.memory_space<vmem>>, vector<1x128xf32>
    %11 = vector.broadcast %10 : vector<1x128xf32> to vector<8x128xf32>
    %12 = arith.addf %9, %11 : vector<8x128xf32>
    %cst_11 = arith.constant 0.000000e+00 : f32
    %13 = vector.broadcast %cst_11 : f32 to vector<8x128xf32>
    %14 = arith.maximumf %12, %13 : vector<8x128xf32>
    %c0_12 = arith.constant 0 : index
    %c0_13 = arith.constant 0 : index
    %15 = vector.load %arg6[%c0_12, %c0_13] : memref<128x128xf32, #tpu.memory_space<vmem>>, vector<128x128xf32>
    %cst_14 = arith.constant dense<0.000000e+00> : vector<8x128xf32>
    %16 = tpu.matmul %14, %15, %cst_14 {dimension_numbers = #tpu.dot_dimension_numbers<[1], [0], [0], [1], [0, 0, 1, 1], [], []>} : vector<8x128xf32>, vector<128x128xf32>, vector<8x128xf32> -> vector<8x128xf32>
    %c0_15 = arith.constant 0 : index
    %c0_16 = arith.constant 0 : index
    %17 = vector.load %arg7[%c0_15, %c0_16] : memref<1x128xf32, #tpu.memory_space<vmem>>, vector<1x128xf32>
    %18 = vector.broadcast %17 : vector<1x128xf32> to vector<8x128xf32>
    %19 = arith.addf %16, %18 : vector<8x128xf32>
    %c0_17 = arith.constant 0 : index
    %c0_18 = arith.constant 0 : index
    %20 = vector.load %arg8[%c0_17, %c0_18] : memref<8x128xf32, #tpu.memory_space<vmem>>, vector<8x128xf32>
    tpu.vector_store %arg8[%c0_17, %c0_18], %19 {strides = array<i32>} : memref<8x128xf32, #tpu.memory_space<vmem>>, vector<8x128xf32>,
    return
  }
  func.func @transform_0(%arg0: i32) -> (i32, i32) {
    %c0_i32 = arith.constant 0 : i32
    %c0_i32_0 = arith.constant 0 : i32
    return %arg0, %c0_i32 : i32, i32
  }
  func.func @transform_1(%arg0: i32) -> (i32, i32) {
    %c0_i32 = arith.constant 0 : i32
    %c0_i32_0 = arith.constant 0 : i32
    %c0_i32_1 = arith.constant 0 : i32
    return %c0_i32, %c0_i32_0 : i32, i32
  }
  func.func @transform_2(%arg0: i32) -> (i32, i32) {
    %c0_i32 = arith.constant 0 : i32
    %c0_i32_0 = arith.constant 0 : i32
    %c0_i32_1 = arith.constant 0 : i32
    return %c0_i32, %c0_i32_0 : i32, i32
  }
  func.func @transform_3(%arg0: i32) -> (i32, i32) {
    %c0_i32 = arith.constant 0 : i32
    %c0_i32_0 = arith.constant 0 : i32
    %c0_i32_1 = arith.constant 0 : i32
    return %c0_i32, %c0_i32_0 : i32, i32
  }
  func.func @transform_4(%arg0: i32) -> (i32, i32) {
    %c0_i32 = arith.constant 0 : i32
    %c0_i32_0 = arith.constant 0 : i32
    %c0_i32_1 = arith.constant 0 : i32
    return %c0_i32, %c0_i32_0 : i32, i32
  }
  func.func @transform_5(%arg0: i32) -> (i32, i32) {
    %c0_i32 = arith.constant 0 : i32
    %c0_i32_0 = arith.constant 0 : i32
    %c0_i32_1 = arith.constant 0 : i32
    return %c0_i32, %c0_i32_0 : i32, i32
  }
  func.func @transform_6(%arg0: i32) -> (i32, i32) {
    %c0_i32 = arith.constant 0 : i32
    %c0_i32_0 = arith.constant 0 : i32
    %c0_i32_1 = arith.constant 0 : i32
    return %c0_i32, %c0_i32_0 : i32, i32
  }
  func.func @transform_7(%arg0: i32) -> (i32, i32) {
    %c0_i32 = arith.constant 0 : i32
    %c0_i32_0 = arith.constant 0 : i32
    return %arg0, %c0_i32 : i32, i32
  }
}

</mosaic_0001>

<bundles_post_ra>
// kernel: tpu_custom_call.1
= control target key start
LH: loop header
LB: loop body
LE: loop exit
PB: predicated region body
PF: predicated region fallthrough
CT: control target
= control target key end

     0   :  { %6 = vsyncpa [#allocation3], 0  ;;  %s481_s0 = inlined_call_operand.hbm [shape: f32[16,128], index: 0, kind: input, shape index: {}]   ;;  %s482_s1 = inlined_call_operand.hbm [shape: f32[16,128], index: 1, kind: output, shape index: {}]  }
   0x1   :  { %7 = vsyncpa [#allocation4], 0 }
   0x2   :  { %9 = vsyncpa [#allocation4 + $0x1], 0  ;;  %s361_s6 = smov 0   ;;  %s363_s7 = smov 0  }
   0x3   :  { %s365_s8 = smov 0   ;;  %s367_s9 = smov 0  }
   0x4 LB: > { %s382_s10 = sadd.s32 4294967295, %s348_s9   ;;  %s197_s11 = sadd.s32 4294967294, %s348_s9   ;;  %s348_s9 = sphi %s367_s9, %s491_s9   ;;  %s344_s8 = sphi %s365_s8, %s490_s8   ;;  %s340_s7 = sphi %s363_s7, %s489_s7   ;;  %s336_s6 = sphi %s361_s6, %s488_s6  }
   0x5   : > { %s386_s12 = sadd.s32 1, %s348_s9   ;;  %s22_s13 = sadd.s32 1, %s344_s8 }
   0x6   : > { %s19_s14 = ssub.s32 %s348_s9, %s386_s12  ;;  %p35_p0 = scmp.ne.s32.totalorder %s340_s7, %s336_s6 }
   0x7   : > { %p20_p1 = scmp.eq.s32.totalorder %s19_s14, 0  ;;  %p36_p2 = scmp.eq.s32.totalorder %s382_s10, 0 }
   0x8   : > { %p58_p3 = scmp.ne.s32.totalorder %s344_s8, %s340_s7  ;;  %p59_p4 = scmp.eq.s32.totalorder %s382_s10, 1 }
   0x9   : > { %s398_s15 = scalar_select %p20_p1, %s344_s8, %s22_s13  }
   0xa   : > { %p400_p5 = por %p36_p2, %p35_p0  ;;  %p404_p6 = por %p59_p4, %p58_p3 }
   0xb   : > { %p65_p7 = scmp.eq.s32.totalorder %s197_s11, 1  ;;  %p198_p8 = scmp.ge.s32.totalorder %s348_s9, 1 }
   0xc   : > { %p72_p9 = scmp.lt.s32.totalorder %s348_s9, 3  ;;  %s199_s18 = sshll.u32 %s382_s10, 3 }
   0xd   : > { %p411_p10 = por %p65_p7, %p35_p0  ;;  %s84_s22 = scalar_lea.hbm %s481_s0, %s199_s18 }
   0xe   : > { %p420_p11 = pnand %p198_p8, %p72_p9  ;;  %s86_s24 = sshll.u32 %s84_s22, 4  ;;  %s87_s24 = int_to_ptr.hbm [resolvable:$true] %s86_s24 }
   0xf   : > { %s350_s25 = smov [#allocation2]   ;;  %s252_s28 = sshra.s32 %s87_s24, 4  ;;  %s253_s28 = int_to_ptr.hbm [resolvable:$true] %s252_s28 }
  0x10   : > { %p210_p12 = pneg %p420_p11  ;;  %s88_s26 = sshll.u32 %s350_s25, 4  ;;  %s89_s26 = int_to_ptr.vmem [resolvable:$true] %s88_s26 }
  0x11   : > { %s254_s29 = scalar_lea.hbm %s253_s28, 8  ;;  %s259_s3 = scalar_lea.hbm %s481_s0, 16 }
  0x12   : > { %p428_p13 = pnand %p210_p12, %p400_p5  ;;  %p255_p0 = scmp.ne.s32.totalorder %s253_s28, %s254_s29 }
  0x13   : > { %p260_p4 = scmp.lt.s32.totalorder %s253_s28, %s481_s0  ;;  %p261_p7 = scmp.lt.s32.totalorder %s259_s3, %s254_s29 }
  0x14   : > { %p256_p1 = pneg %p428_p13 }
  0x15   : > { %p262_p8 = por %p261_p7, %p260_p4 }
  0x16   : > { %p257_p2 = pnand %p256_p1, %p255_p0 }
  0x18   : > { %p258_p3 = pneg %p257_p2 }
  0x1a   : > { %p263_p9 = pnand %p262_p8, %p258_p3 }
  0x1c   : > { %266 = shalt.err (!%p263_p9)
}
  0x1d   : > { %213 = dma.hbm_to_vmem [thread:$0]  (!%p428_p13), %s87_s24, 128, %s89_s26, [#allocation3]  }
  0x1e   : > { %101 = sbr.rel (%p420_p11) target bundleno = 51 (0x33), region = 24 }
  0x23   : > { %327 = dma.done.wait (%p400_p5), [#allocation3], 128  }
  0x24   : > { %329 = vsyncadd (%p400_p5), [#allocation3], 4294967168  ;;  %s114_s11 = sand.u32 1, %s340_s7   ;;  %s131_s21 = scalar_lea.hbm %s482_s1, %s199_s18  ;;  %v117_v0 = vld [vmem:[#allocation2] sm:$0xff] }
  0x25   : > { %s201_s13 = sshll.u32 %s114_s11, 3  ;;  %s135_s23 = sshll.u32 %s131_s21, 4  ;;  %v118_v1 = vmul.f32 2.0, %v117_v0  ;;  %s136_s23 = int_to_ptr.hbm [resolvable:$true] %s135_s23 }
  0x26   : > { %s116_s22 = scalar_lea.vmem [#allocation5], %s201_s13  ;;  %s121_s16 = scalar_lea.sflag [#allocation4], %s114_s11 }
  0x27   : > { %s133_s24 = sshll.u32 %s116_s22, 4  ;;  %119 = vst [vmem:[%s116_s22] sm:$0xff] %v118_v1  ;;  %s296_s25 = sshra.s32 %s136_s23, 4  ;;  %s134_s24 = int_to_ptr.vmem [resolvable:$true] %s133_s24  ;;  %s297_s25 = int_to_ptr.hbm [resolvable:$true] %s296_s25 }
  0x28   : > { %s298_s26 = scalar_lea.hbm %s297_s25, 8  ;;  %s302_s18 = scalar_lea.hbm %s482_s1, 16 }
  0x29   : > { %p299_p5 = scmp.ne.s32.totalorder %s297_s25, %s298_s26  ;;  %p303_p13 = scmp.lt.s32.totalorder %s297_s25, %s482_s1 }
  0x2a   : > { %p304_p0 = scmp.lt.s32.totalorder %s302_s18, %s298_s26 }
  0x2b   : > { %p300_p11 = pnand %p299_p5, %p404_p6 }
  0x2c   : > { %p305_p1 = por %p304_p0, %p303_p13 }
  0x2d   : > { %p301_p12 = pneg %p300_p11 }
  0x2f   : > { %p306_p2 = pnand %p305_p1, %p301_p12 }
  0x31   : > { %309 = shalt.err (!%p306_p2)
}
  0x32   : > { %208 = dma.vmem_to_hbm [thread:$0]  (%p404_p6), %s134_s24, 128, %s136_s23, %s121_s16  }
  0x33 PF: > { %p218_p3 = scmp.ge.s32.totalorder %s348_s9, 2  ;;  %s147_s30 = sand.u32 1, %s336_s6  }
  0x34   : > { %s148_s2 = scalar_lea.sflag [#allocation4], %s147_s30 }
  0x35   : > { %p215_p4 = pnand %p218_p3, %p411_p10 }
  0x37   : > { %p216_p7 = pneg %p215_p4 }
  0x39   : > { %331 = dma.done.wait (%p216_p7), %s148_s2, 128  }
  0x3a   : > { %333 = vsyncadd (%p216_p7), %s148_s2, 4294967168  ;;  %p12_p8 = scmp.ge.s32.totalorder %s386_s12, 4   ;;  %s488_s6 = smov %s340_s7 }
  0x3b   : > { %s489_s7 = smov %s344_s8  ;;  %s490_s8 = smov %s398_s15 }
  0x3c   : > { %s491_s9 = smov %s386_s12  ;;  %14 = sbr.rel (!%p12_p8) target bundleno = 4 (0x4), region = 62 }
  0x41   :  { %154 = vsyncpa [#allocation3], 1 }
  0x42   :  { %156 = vsyncpa [#allocation3 + $0x1], 1 }
  0x43   :  { %157 = vsyncpa [#allocation4], 1 }
  0x44   :  { %159 = vsyncpa [#allocation4 + $0x1], 1 }

// kernel: tpu_custom_call.1
= control target key start
LH: loop header
LB: loop body
LE: loop exit
PB: predicated region body
PF: predicated region fallthrough
CT: control target
= control target key end

     0   :  { %12 = vsyncpa [#allocation3], 0  ;;  %s440_s0 = inlined_call_operand.hbm [shape: f32[8,128], index: 0, kind: input, shape index: {}]   ;;  %s441_s1 = inlined_call_operand.hbm [shape: f32[128,128], index: 1, kind: input, shape index: {}]   ;;  %s442_s2 = inlined_call_operand.vmem [shape: f32[1,128], index: 2, kind: input, shape index: {}]   ;;  %s443_s3 = inlined_call_operand.hbm [shape: f32[128,128], index: 3, kind: input, shape index: {}]   ;;  %s444_s4 = inlined_call_operand.vmem [shape: f32[1,128], index: 4, kind: input, shape index: {}]   ;;  %s445_s5 = inlined_call_operand.hbm [shape: f32[128,128], index: 5, kind: input, shape index: {}]   ;;  %s446_s6 = inlined_call_operand.vmem [shape: f32[1,128], index: 6, kind: input, shape index: {}]   ;;  %s447_s7 = inlined_call_operand.hbm [shape: f32[8,128], index: 7, kind: output, shape index: {}]  }
   0x1   :  { %13 = vsyncpa [#allocation6], 0 }
   0x2   :  { %14 = vsyncpa [#allocation9], 0  ;;  %s31_s26 = sshll.u32 %s441_s1, 4  ;;  %s32_s26 = int_to_ptr.hbm [resolvable:$true] %s31_s26 }
   0x3   :  { %15 = vsyncpa [#allocation4], 0  ;;  %s369_s27 = smov [#allocation5]   ;;  %s21_s8 = sshll.u32 %s440_s0, 4  ;;  %s22_s8 = int_to_ptr.hbm [resolvable:$true] %s21_s8 }
   0x4   :  { %s33_s28 = sshll.u32 %s369_s27, 4  ;;  %s370_s9 = smov 128   ;;  %s34_s28 = int_to_ptr.vmem [resolvable:$true] %s33_s28 }
   0x5   :  { %s371_s10 = smov 8   ;;  %s372_s11 = smov [#allocation2]  }
   0x6   :  { %39 = dma.hbm_to_vmem [thread:$0]  %s32_s26, 2048, %s34_s28, [#allocation6], %s370_s9, %s370_s9, %s371_s10  }
   0x7   :  { %s23_s12 = sshll.u32 %s372_s11, 4  ;;  %s46_s15 = sshll.u32 %s443_s3, 4  ;;  %s24_s12 = int_to_ptr.vmem [resolvable:$true] %s23_s12  ;;  %s47_s15 = int_to_ptr.hbm [resolvable:$true] %s46_s15 }
   0x8   :  { %26 = dma.hbm_to_vmem [thread:$0]  %s22_s8, 128, %s24_s12, [#allocation3]  }
   0x9   :  { %s61_s17 = sshll.u32 %s445_s5, 4  ;;  %s373_s18 = smov [#allocation7]   ;;  %s62_s17 = int_to_ptr.hbm [resolvable:$true] %s61_s17 }
   0xa   :  { %s48_s19 = sshll.u32 %s373_s18, 4  ;;  %s374_s0 = smov [#allocation8]   ;;  %s49_s19 = int_to_ptr.vmem [resolvable:$true] %s48_s19 }
   0xb   :  { %54 = dma.hbm_to_vmem [thread:$0]  %s47_s15, 2048, %s49_s19, [#allocation6], %s370_s9, %s370_s9, %s371_s10  }
   0xc   :  { %s63_s20 = sshll.u32 %s374_s0, 4  ;;  %s64_s20 = int_to_ptr.vmem [resolvable:$true] %s63_s20 }
   0xd   :  { %69 = dma.hbm_to_vmem [thread:$0]  %s62_s17, 2048, %s64_s20, [#allocation9], %s370_s9, %s370_s9, %s371_s10  }
   0xe   :  { %361 = dma.done.wait [#allocation3], 128  }
   0xf   :  { %362 = vsyncadd [#allocation3], 4294967168 }
  0x10   :  { %363 = dma.done.wait [#allocation6], 4096  }
  0x11   :  { %364 = vsyncadd [#allocation6], 4294963200 }
  0x12   :  { %365 = dma.done.wait [#allocation9], 2048  }
  0x13   :  { %366 = vsyncadd [#allocation9], 4294965248  ;;  %v104_v0 = vld [vmem:[#allocation5 + $0x78] sm:$0xff]  ;;  %v103_v1 = vld [vmem:[#allocation5 + $0x70] sm:$0xff]  ;;  %s375_s24 = smov [#allocation10]   ;;  %s219_s28 = sshll.u32 %s447_s7, 4  ;;  %s220_s28 = int_to_ptr.hbm [resolvable:$true] %s219_s28 }
  0x14   :  { %109 = vmatpush.msra.mxu0 %v104_v0  ;;  %v102_v2 = vld [vmem:[#allocation5 + $0x68] sm:$0xff]  ;;  %v101_v3 = vld [vmem:[#allocation5 + $0x60] sm:$0xff]  ;;  %v145_v4 = vld [vmem:[#allocation7 + $0x78] sm:$0xff]  ;;  %s217_s25 = sshll.u32 %s375_s24, 4  ;;  %s218_s25 = int_to_ptr.vmem [resolvable:$true] %s217_s25 }
  0x15   :  { %v100_v5 = vld [vmem:[#allocation5 + $0x58] sm:$0xff]  ;;  %150 = vmatpush.msra.mxu1 %v145_v4  ;;  %v144_v6 = vld [vmem:[#allocation7 + $0x70] sm:$0xff]  ;;  %v143_v7 = vld [vmem:[#allocation7 + $0x68] sm:$0xff] }
  0x16   :  { %110 = vmatpush.msra.mxu0 %v103_v1  ;;  %v99_v8 = vld [vmem:[#allocation5 + $0x50] sm:$0xff]  ;;  %v142_v9 = vld [vmem:[#allocation7 + $0x60] sm:$0xff]  ;;  %v98_v10 = vld [vmem:[#allocation5 + $0x48] sm:$0xff] }
  0x17   :  { %151 = vmatpush.msra.mxu1 %v144_v6  ;;  %v141_v11 = vld [vmem:[#allocation7 + $0x58] sm:$0xff]  ;;  %v97_v12 = vld [vmem:[#allocation5 + $0x40] sm:$0xff]  ;;  %v140_v13 = vld [vmem:[#allocation7 + $0x50] sm:$0xff] }
  0x18   :  { %111 = vmatpush.msra.mxu0 %v102_v2  ;;  %v96_v14 = vld [vmem:[#allocation5 + $0x38] sm:$0xff]  ;;  %v139_v15 = vld [vmem:[#allocation7 + $0x48] sm:$0xff]  ;;  %v95_v16 = vld [vmem:[#allocation5 + $0x30] sm:$0xff] }
  0x19   :  { %152 = vmatpush.msra.mxu1 %v143_v7  ;;  %v138_v17 = vld [vmem:[#allocation7 + $0x40] sm:$0xff]  ;;  %v94_v18 = vld [vmem:[#allocation5 + $0x28] sm:$0xff]  ;;  %v137_v19 = vld [vmem:[#allocation7 + $0x38] sm:$0xff] }
  0x1a   :  { %112 = vmatpush.msra.mxu0 %v101_v3  ;;  %v93_v20 = vld [vmem:[#allocation5 + $0x20] sm:$0xff]  ;;  %v136_v21 = vld [vmem:[#allocation7 + $0x30] sm:$0xff]  ;;  %v92_v22 = vld [vmem:[#allocation5 + $0x18] sm:$0xff] }
  0x1b   :  { %153 = vmatpush.msra.mxu1 %v142_v9  ;;  %v135_v23 = vld [vmem:[#allocation7 + $0x28] sm:$0xff]  ;;  %v91_v24 = vld [vmem:[#allocation5 + $0x10] sm:$0xff]  ;;  %v134_v25 = vld [vmem:[#allocation7 + $0x20] sm:$0xff] }
  0x1c   :  { %113 = vmatpush.msra.mxu0 %v100_v5  ;;  %v90_v26 = vld [vmem:[#allocation5 + $0x8] sm:$0xff]  ;;  %v133_v27 = vld [vmem:[#allocation7 + $0x18] sm:$0xff]  ;;  %v89_v28 = vld [vmem:[#allocation5] sm:$0xff] }
  0x1d   :  { %154 = vmatpush.msra.mxu1 %v141_v11  ;;  %v88_v29 = vld [vmem:[#allocation2] sm:$0xff]  ;;  %v132_v30 = vld [vmem:[#allocation7 + $0x10] sm:$0xff]  ;;  %v131_v31 = vld [vmem:[#allocation7 + $0x8] sm:$0xff] }
  0x1e   :  { %114 = vmatpush.msra.mxu0 %v99_v8  ;;  %v130_v32 = vld [vmem:[#allocation7] sm:$0xff]  ;;  %v186_v33 = vld [vmem:[#allocation8 + $0x78] sm:$0xff]  ;;  %v185_v34 = vld [vmem:[#allocation8 + $0x70] sm:$0xff] }
  0x1f   :  { %155 = vmatpush.msra.mxu1 %v140_v13  ;;  %191 = vmatpush.msra.mxu2 %v186_v33  ;;  %v184_v35 = vld [vmem:[#allocation8 + $0x68] sm:$0xff]  ;;  %v183_v36 = vld [vmem:[#allocation8 + $0x60] sm:$0xff]  ;;  %v182_v37 = vld [vmem:[#allocation8 + $0x58] sm:$0xff] }
  0x20   :  { %115 = vmatpush.msra.mxu0 %v98_v10  ;;  %v181_v38 = vld [vmem:[#allocation8 + $0x50] sm:$0xff]  ;;  %v180_v39 = vld [vmem:[#allocation8 + $0x48] sm:$0xff]  ;;  %v179_v40 = vld [vmem:[#allocation8 + $0x40] sm:$0xff] }
  0x21   :  { %156 = vmatpush.msra.mxu1 %v139_v15  ;;  %192 = vmatpush.msra.mxu2 %v185_v34  ;;  %v178_v41 = vld [vmem:[#allocation8 + $0x38] sm:$0xff]  ;;  %v177_v42 = vld [vmem:[#allocation8 + $0x30] sm:$0xff]  ;;  %v176_v43 = vld [vmem:[#allocation8 + $0x28] sm:$0xff] }
  0x22   :  { %116 = vmatpush.msra.mxu0 %v97_v12  ;;  %v175_v44 = vld [vmem:[#allocation8 + $0x20] sm:$0xff]  ;;  %v174_v45 = vld [vmem:[#allocation8 + $0x18] sm:$0xff]  ;;  %v173_v50 = vld [vmem:[#allocation8 + $0x10] sm:$0xff] }
  0x23   :  { %157 = vmatpush.msra.mxu1 %v138_v17  ;;  %193 = vmatpush.msra.mxu2 %v184_v35  ;;  %v238_v46 = vld [vmem:[%s442_s2] ss:$0 sm:$0xff]  ;;  %v172_v51 = vld [vmem:[#allocation8 + $0x8] sm:$0xff]  ;;  %v171_v52 = vld [vmem:[#allocation8] sm:$0xff] }
  0x24   :  { %117 = vmatpush.msra.mxu0 %v96_v14  ;;  %v239_v53 = vld [vmem:[%s444_s4] ss:$0 sm:$0xff] }
  0x25   :  { %158 = vmatpush.msra.mxu1 %v137_v19  ;;  %194 = vmatpush.msra.mxu2 %v183_v36  ;;  %v240_v57 = vld [vmem:[%s446_s6] ss:$0 sm:$0xff] }
  0x26   :  { %118 = vmatpush.msra.mxu0 %v95_v16 }
  0x27   :  { %159 = vmatpush.msra.mxu1 %v136_v21  ;;  %195 = vmatpush.msra.mxu2 %v182_v37 }
  0x28   :  { %119 = vmatpush.msra.mxu0 %v94_v18 }
  0x29   :  { %160 = vmatpush.msra.mxu1 %v135_v23  ;;  %196 = vmatpush.msra.mxu2 %v181_v38 }
  0x2a   :  { %120 = vmatpush.msra.mxu0 %v93_v20 }
  0x2b   :  { %161 = vmatpush.msra.mxu1 %v134_v25  ;;  %197 = vmatpush.msra.mxu2 %v180_v39 }
  0x2c   :  { %121 = vmatpush.msra.mxu0 %v92_v22 }
  0x2d   :  { %162 = vmatpush.msra.mxu1 %v133_v27  ;;  %198 = vmatpush.msra.mxu2 %v179_v40 }
  0x2e   :  { %122 = vmatpush.msra.mxu0 %v91_v24 }
  0x2f   :  { %163 = vmatpush.msra.mxu1 %v132_v30  ;;  %199 = vmatpush.msra.mxu2 %v178_v41 }
  0x30   :  { %123 = vmatpush.msra.mxu0 %v90_v26 }
  0x31   :  { %164 = vmatpush.msra.mxu1 %v131_v31  ;;  %200 = vmatpush.msra.mxu2 %v177_v42 }
  0x32   :  { %124 = vmatpush.msra.mxu0 %v89_v28 }
  0x33   :  { %125 = vmatmul.f32.vlgmr.msra.gmra.mxu0 %v88_v29  ;;  %165 = vmatpush.msra.mxu1 %v130_v32 }
  0x34   :  { %201 = vmatpush.msra.mxu2 %v176_v43 }
  0x36   :  { %202 = vmatpush.msra.mxu2 %v175_v44 }
  0x38   :  { %203 = vmatpush.msra.mxu2 %v174_v45 }
  0x3a   :  { %204 = vmatpush.msra.mxu2 %v173_v50 }
  0x3c   :  { %205 = vmatpush.msra.mxu2 %v172_v51 }
  0x3e   :  { %206 = vmatpush.msra.mxu2 %v171_v52 }
  0xb0   :  { %v126_v47 = vpop.f32.mrf.mxu0 }
  0xb1   :  { %v127_v48 = vadd.f32 %v238_v46, %v126_v47 }
  0xb3   :  { %v129_v49 = vmax.f32 %v127_v48, 0.0 }
  0xb5   :  { %166 = vmatmul.f32.vlgmr.msra.gmra.mxu1 %v129_v49 }
 0x132   :  { %v167_v54 = vpop.f32.mrf.mxu1 }
 0x133   :  { %v168_v55 = vadd.f32 %v239_v53, %v167_v54 }
 0x135   :  { %v170_v56 = vmax.f32 %v168_v55, 0.0 }
 0x137   :  { %207 = vmatmul.f32.vlgmr.msra.gmra.mxu2 %v170_v56 }
 0x1ba   :  { %v208_v58 = vpop.f32.mrf.mxu2 }
 0x1bb   :  { %v209_v59 = vadd.f32 %v240_v57, %v208_v58 }
 0x1bd   :  { %211 = vst [vmem:[#allocation10] sm:$0xff] %v209_v59 }
 0x1be   :  { %222 = dma.vmem_to_hbm [thread:$0]  %s218_s25, 128, %s220_s28, [#allocation4]  }
 0x1bf   :  { %367 = dma.done.wait [#allocation4], 128  }
 0x1c0   :  { %368 = vsyncadd [#allocation4], 4294967168 }
 0x1c1   :  { %227 = vsyncpa [#allocation3], 1 }
 0x1c2   :  { %228 = vsyncpa [#allocation6], 1 }
 0x1c3   :  { %229 = vsyncpa [#allocation9], 1 }
 0x1c4   :  { %230 = vsyncpa [#allocation4], 1 }

</bundles_post_ra>
